<compile_context>
chip_gen: v7x
topology: tpu7x:2x2x1
jax: 0.10.0
libtpu: 0.0.40
codegen_flags: <defaults>
</compile_context>

<pallas_src>
import jax
import jax.numpy as jnp
from jax.experimental import pallas as pl
from jax.experimental.pallas import tpu as pltpu


def _round_up(x: int, m: int) -> int:
    return (x + m - 1) // m * m


def _cdiv(a: int, b: int) -> int:
    return -(-a // b)


def _vmem_capacity_bytes() -> int:
    """Physical VMEM of the current chip; conservative (v7x-sized) fallback."""
    try:
        info = pltpu.get_tpu_info()
        for attr in ("vmem_capacity_bytes", "vmem_bytes", "vmem_size_bytes"):
            cap = getattr(info, attr, None)
            if cap:
                return int(cap)
    except Exception:
        pass
    return 64 * 1024 * 1024


def make_rzloss(margin: float, gamma: float):
    """Returns rzloss(feat, target) -> scalar loss, mirroring the PyTorch module."""

    def rzloss(feat, target):
        n, c = feat.shape
        in_dtype = feat.dtype
        itemsize = jnp.dtype(in_dtype).itemsize

        # --- generation-aware budgets --------------------------------------
        vmem_cap = _vmem_capacity_bytes()
        if vmem_cap >= 128 * 1024 * 1024:            # v5e / v6e
            block_budget = 8 * 1024 * 1024           # f32 bytes of one feat tile
            vmem_limit = 64 * 1024 * 1024
            min_tiles = 1
        else:                                        # v7x (64 MiB physical, 2 TCs)
            block_budget = 4 * 1024 * 1024
            vmem_limit = 32 * 1024 * 1024
            min_tiles = 2

        # --- row tiling (class dim kept full-extent, never padded) ---------
        n8 = _round_up(n, 8)
        max_rows = max(8, (block_budget // max(c * 4, 1)) // 8 * 8)
        tile_cap = min(n8, max_rows)
        if min_tiles > 1 and n8 > 8:
            # Keep >= 2 tiles so both v7x TensorCores get work.
            tile_cap = min(tile_cap, max(8, _round_up(_cdiv(n8, min_tiles), 8)))
        num_tiles = _cdiv(n8, tile_cap)
        tile_n = _round_up(_cdiv(n8, num_tiles), 8)  # balanced tiles, minimal pad
        n_pad = tile_n * num_tiles

        # Pad rows only when actually needed (avoids an N x C HBM copy otherwise).
        if n_pad != n:
            feat_p = jnp.pad(feat, ((0, n_pad - n), (0, 0)))
            tgt_p = jnp.pad(target.astype(jnp.int32), (0, n_pad - n))
        else:
            feat_p = feat
            tgt_p = target.astype(jnp.int32)
        tgt_p = tgt_p.reshape(n_pad, 1)

        def kernel(feat_ref, tgt_ref, out_ref):
            feat_t = feat_ref[...].astype(jnp.float32)         # (tile_n, c)
            tgt_t = tgt_ref[...]                                # (tile_n, 1) int32
            tn, cc = feat_t.shape

            col = jax.lax.broadcasted_iota(jnp.int32, (tn, cc), 1)
            onehot = col == tgt_t

            # ---- pass 1: non-target logits, target feature, masked row max
            # fin = relu(feat + margin) * (feat - margin) * gamma  (all lanes);
            # the target lane is killed here and added back analytically.
            fin = jnp.maximum(feat_t + margin, 0.0) * (feat_t - margin) * gamma
            fin = jnp.where(onehot, -1e30, fin)
            target_feat = jnp.sum(jnp.where(onehot, feat_t, 0.0),
                                  axis=1, keepdims=True)        # (tile_n, 1)
            row_max = jnp.max(fin, axis=1, keepdims=True)

            # Target-lane logit, analytic (per-row scalar work only):
            #   sp    = relu(1 + margin - feat[target])
            #   fin_t = sp * (feat[target] - (1 - margin)) * gamma
            sp = jnp.maximum(1.0 + margin - target_feat, 0.0)
            fin_t = sp * (target_feat - (1.0 - margin)) * gamma

            m = jnp.maximum(row_max, fin_t)

            # ---- pass 2: exp + row-sum; target term folded in as a scalar.
            ssum = (jnp.sum(jnp.exp(fin - m), axis=1, keepdims=True)
                    + jnp.exp(fin_t - m))
            neg_logp = (m + jnp.log(ssum)) - fin_t              # (tile_n, 1)

            if n_pad != n:  # trace-time conditional: only emit mask when padded
                row = (jax.lax.broadcasted_iota(jnp.int32, (tn, 1), 0)
                       + pl.program_id(0) * tn)
                neg_logp = jnp.where(row < n, neg_logp, 0.0)

            # Lane-dense (unmasked) store of the per-tile partial sum.
            out_ref[...] = jnp.broadcast_to(jnp.sum(neg_logp), (1, 8, 128))

        cost = pl.CostEstimate(
            flops=9 * n * c,
            transcendentals=n * c,
            bytes_accessed=n * c * itemsize + n * 4 + num_tiles * 8 * 128 * 4,
        )

        partials = pl.pallas_call(
            kernel,
            out_shape=jax.ShapeDtypeStruct((num_tiles, 8, 128), jnp.float32),
            grid_spec=pltpu.PrefetchScalarGridSpec(
                num_scalar_prefetch=0,
                grid=(num_tiles,),
                in_specs=[
                    pl.BlockSpec((tile_n, c), lambda i: (i, 0)),   # full-extent C
                    pl.BlockSpec((tile_n, 1), lambda i: (i, 0)),
                ],
                out_specs=pl.BlockSpec((1, 8, 128), lambda i: (i, 0, 0)),
            ),
            compiler_params=pltpu.CompilerParams(
                dimension_semantics=("parallel",),
                vmem_limit_bytes=vmem_limit,
            ),
            cost_estimate=cost,
        )(feat_p, tgt_p)

        # Reduce per-tile partial sums in the wrapper (keeps the grid parallel).
        return jnp.sum(partials[:, 0, 0]) / n

    return rzloss


def rzloss_reference(feat, target, margin, gamma):
    """Pure-JAX reference for correctness checks."""
    n, c = feat.shape
    feat = feat.astype(jnp.float32)
    onehot = jax.nn.one_hot(target, c, dtype=jnp.bool_)
    feat_vec = jnp.maximum(feat + margin, 0.0)
    tf = jnp.sum(jnp.where(onehot, feat, 0.0), axis=1, keepdims=True)
    sp = jnp.maximum(-tf + 1.0 + margin, 0.0)
    feat_vec = jnp.where(onehot, sp, feat_vec)
    sigma = jnp.where(onehot, 1.0 - margin, margin)
    fin = feat_vec * (feat - sigma) * gamma
    logp = jax.nn.log_softmax(fin, axis=1)
    return -jnp.mean(jnp.sum(jnp.where(onehot, logp, 0.0), axis=1))


if __name__ == "__main__":
    MARGIN = 0.5
    GAMMA = 2.0

    loss_fn = make_rzloss(MARGIN, GAMMA)

    key = jax.random.PRNGKey(0)
    kf, kt, kf2, kt2 = jax.random.split(key, 4)

    # Primary small case (batch=8, classes=32): no padding at all, single tile.
    feat = jax.random.normal(kf, (8, 32), dtype=jnp.float32)
    target = jax.random.randint(kt, (8,), 0, 32, dtype=jnp.int32)
    loss = loss_fn(feat, target)
    jax.block_until_ready(loss)
    ref = rzloss_reference(feat, target, MARGIN, GAMMA)
    assert jnp.allclose(loss, ref, rtol=1e-4, atol=1e-4), (loss, ref)

    # Multi-row case with ragged class dim and bf16 on the wire: exercises the
    # full-extent C block, the row pad path, and the parallel row grid.
    feat2 = jax.random.normal(kf2, (1030, 200), dtype=jnp.bfloat16)
    target2 = jax.random.randint(kt2, (1030,), 0, 200, dtype=jnp.int32)
    loss2 = loss_fn(feat2, target2)
    jax.block_until_ready(loss2)
    ref2 = rzloss_reference(feat2, target2, MARGIN, GAMMA)
    assert jnp.allclose(loss2, ref2, rtol=1e-3, atol=1e-3), (loss2, ref2)

    print("KERNEL_OK")
</pallas_src>

<mosaic_0001>
module attributes {stable_mosaic.version = 11 : i64} {
  func.func @kernel(%arg0: i32, %arg1: memref<8x32xf32, #tpu.memory_space<vmem>>, %arg2: memref<8x1xi32, #tpu.memory_space<vmem>>, %arg3: memref<1x8x128xf32, #tpu.memory_space<vmem>>) attributes {dimension_semantics = [#tpu.dimension_semantics<parallel>], iteration_bounds = array<i64: 1>, scalar_prefetch = 0 : i64, scratch_operands = 0 : i64, tpu.core_type = #tpu.core_type<tc>, window_params = [{transform_indices = @transform_0, window_bounds = array<i64: 8, 32>}, {transform_indices = @transform_1, window_bounds = array<i64: 8, 1>}, {transform_indices = @transform_2, window_bounds = array<i64: 1, 8, 128>}]} {
    %c0 = arith.constant 0 : index
    %c0_0 = arith.constant 0 : index
    %0 = vector.load %arg1[%c0, %c0_0] : memref<8x32xf32, #tpu.memory_space<vmem>>, vector<8x32xf32>
    %c0_1 = arith.constant 0 : index
    %c0_2 = arith.constant 0 : index
    %1 = vector.load %arg2[%c0_1, %c0_2] : memref<8x1xi32, #tpu.memory_space<vmem>>, vector<8x1xi32>
    %2 = tpu.iota {dimensions = array<i32: 1>} : vector<8x32xi32>
    %3 = vector.broadcast %1 : vector<8x1xi32> to vector<8x32xi32>
    %4 = arith.cmpi eq, %2, %3 : vector<8x32xi32>
    %cst = arith.constant 5.000000e-01 : f32
    %5 = vector.broadcast %cst : f32 to vector<8x32xf32>
    %6 = arith.addf %0, %5 : vector<8x32xf32>
    %cst_3 = arith.constant 0.000000e+00 : f32
    %7 = vector.broadcast %cst_3 : f32 to vector<8x32xf32>
    %8 = arith.maximumf %6, %7 : vector<8x32xf32>
    %cst_4 = arith.constant 5.000000e-01 : f32
    %9 = vector.broadcast %cst_4 : f32 to vector<8x32xf32>
    %10 = arith.subf %0, %9 : vector<8x32xf32>
    %11 = arith.mulf %8, %10 : vector<8x32xf32>
    %cst_5 = arith.constant 2.000000e+00 : f32
    %12 = vector.broadcast %cst_5 : f32 to vector<8x32xf32>
    %13 = arith.mulf %11, %12 : vector<8x32xf32>
    %cst_6 = arith.constant -1.000000e+30 : f32
    %14 = vector.broadcast %cst_6 : f32 to vector<8x32xf32>
    %15 = arith.select %4, %14, %13 : vector<8x32xi1>, vector<8x32xf32>
    %cst_7 = arith.constant 0.000000e+00 : f32
    %16 = vector.broadcast %cst_7 : f32 to vector<8x32xf32>
    %17 = arith.select %4, %0, %16 : vector<8x32xi1>, vector<8x32xf32>
    %cst_8 = arith.constant dense<0.000000e+00> : vector<8xf32>
    %18 = vector.multi_reduction <add>, %17, %cst_8 [1] : vector<8x32xf32> to vector<8xf32>
    %19 = vector.shape_cast %18 : vector<8xf32> to vector<8x1xf32>
    %cst_9 = arith.constant dense<0xFF800000> : vector<8xf32>
    %20 = vector.multi_reduction <maximumf>, %15, %cst_9 [1] : vector<8x32xf32> to vector<8xf32>
    %21 = vector.shape_cast %20 : vector<8xf32> to vector<8x1xf32>
    %cst_10 = arith.constant 1.500000e+00 : f32
    %22 = vector.broadcast %cst_10 : f32 to vector<8x1xf32>
    %23 = arith.subf %22, %19 : vector<8x1xf32>
    %cst_11 = arith.constant 0.000000e+00 : f32
    %24 = vector.broadcast %cst_11 : f32 to vector<8x1xf32>
    %25 = arith.maximumf %23, %24 : vector<8x1xf32>
    %cst_12 = arith.constant 5.000000e-01 : f32
    %26 = vector.broadcast %cst_12 : f32 to vector<8x1xf32>
    %27 = arith.subf %19, %26 : vector<8x1xf32>
    %28 = arith.mulf %25, %27 : vector<8x1xf32>
    %cst_13 = arith.constant 2.000000e+00 : f32
    %29 = vector.broadcast %cst_13 : f32 to vector<8x1xf32>
    %30 = arith.mulf %28, %29 : vector<8x1xf32>
    %31 = arith.maximumf %21, %30 : vector<8x1xf32>
    %32 = vector.broadcast %31 : vector<8x1xf32> to vector<8x32xf32>
    %33 = arith.subf %15, %32 : vector<8x32xf32>
    %34 = math.exp %33 : vector<8x32xf32>
    %cst_14 = arith.constant dense<0.000000e+00> : vector<8xf32>
    %35 = vector.multi_reduction <add>, %34, %cst_14 [1] : vector<8x32xf32> to vector<8xf32>
    %36 = vector.shape_cast %35 : vector<8xf32> to vector<8x1xf32>
    %37 = arith.subf %30, %31 : vector<8x1xf32>
    %38 = math.exp %37 : vector<8x1xf32>
    %39 = arith.addf %36, %38 : vector<8x1xf32>
    %40 = math.log %39 : vector<8x1xf32>
    %41 = arith.addf %31, %40 : vector<8x1xf32>
    %42 = arith.subf %41, %30 : vector<8x1xf32>
    %43 = vector.shape_cast %42 : vector<8x1xf32> to vector<1x8x1xf32>
    %cst_15 = arith.constant dense<0.000000e+00> : vector<1xf32>
    %44 = vector.multi_reduction <add>, %43, %cst_15 [1, 2] : vector<1x8x1xf32> to vector<1xf32>
    %45 = vector.shape_cast %44 : vector<1xf32> to vector<1x1x1xf32>
    %46 = vector.extract %45[0, 0, 0] : f32 from vector<1x1x1xf32>
    %47 = vector.broadcast %46 : f32 to vector<1x8x128xf32>
    %c0_16 = arith.constant 0 : index
    %c0_17 = arith.constant 0 : index
    %c0_18 = arith.constant 0 : index
    %48 = vector.load %arg3[%c0_16, %c0_17, %c0_18] : memref<1x8x128xf32, #tpu.memory_space<vmem>>, vector<1x8x128xf32>
    tpu.vector_store %arg3[%c0_16, %c0_17, %c0_18], %47 {strides = array<i32>} : memref<1x8x128xf32, #tpu.memory_space<vmem>>, vector<1x8x128xf32>,
    return
  }
  func.func @transform_0(%arg0: i32) -> (i32, i32) {
    %c0_i32 = arith.constant 0 : i32
    %c0_i32_0 = arith.constant 0 : i32
    return %arg0, %c0_i32 : i32, i32
  }
  func.func @transform_1(%arg0: i32) -> (i32, i32) {
    %c0_i32 = arith.constant 0 : i32
    %c0_i32_0 = arith.constant 0 : i32
    return %arg0, %c0_i32 : i32, i32
  }
  func.func @transform_2(%arg0: i32) -> (i32, i32, i32) {
    %c0_i32 = arith.constant 0 : i32
    %c0_i32_0 = arith.constant 0 : i32
    %c0_i32_1 = arith.constant 0 : i32
    return %arg0, %c0_i32, %c0_i32_0 : i32, i32, i32
  }
}

</mosaic_0001>

<bundles_post_ra>
// kernel: tpu_custom_call.1
= control target key start
LH: loop header
LB: loop body
LE: loop exit
PB: predicated region body
PF: predicated region fallthrough
CT: control target
= control target key end

     0   :  { %s156_s0 = inlined_call_operand.vmem [shape: f32[8,32], index: 0, kind: input, shape index: {}]   ;;  %s157_s1 = inlined_call_operand.vmem [shape: s32[8,1], index: 1, kind: input, shape index: {}]   ;;  %s158_s2 = inlined_call_operand.hbm [shape: f32[1,8,128], index: 2, kind: output, shape index: {}]  }
   0x1   :  { %v13_v0 = vld [vmem:[%s157_s1] sm:$0xff] }
   0x2   :  { %7 = vsyncpa [#allocation3], 0  ;;  %v118_v1 = vmov 0   ;;  %v12_v2 = vld [vmem:[%s156_s0] sm:$0xff]  ;;  %v14_v6 = vlaneseq  ;;  %vm27_vm0 = vcmask 261120   ;;  %vm54_vm2 = vcmask 7168  }
   0x3   :  { %87 = vset.pattern.permute.xlu0 %v118_v1  ;;  %v20_v3 = vadd.f32 0.5, %v12_v2  ;;  %v81_v5 = vadd.f32 -0.5, %v12_v2  ;;  %s119_s0 = smov [#allocation2]  }
   0x4   :  { %17 = vperm.xlu0 %87, %v13_v0   ;;  %v15_v8 = vand.u32 127, %v14_v6  ;;  %s73_s1 = sshll.u32 %s119_s0, 4  ;;  %s74_s1 = int_to_ptr.vmem [resolvable:$true] %s73_s1 }
   0x5   :  { %v21_v4 = vmax.f32 %v20_v3, 0.0  ;;  %s94_s14 = scalar_lea.vmem %s74_s1, 128  ;;  %p99_p1 = scmp.lt.s32.totalorder %s74_s1, %s74_s1 }
   0x6   :  { %p95_p0 = scmp.ne.s32.totalorder %s74_s1, %s94_s14  ;;  %p100_p2 = scmp.lt.s32.totalorder %s94_s14, %s94_s14 }
   0x7   :  { %v23_v7 = vmul.f32 %v81_v5, %v21_v4 }
   0x8   :  { %p101_p3 = por %p100_p2, %p99_p1 }
   0x9   :  { %v24_v9 = vmul.f32 2.0, %v23_v7 }
   0xa   :  { %p102_p4 = pnand %p101_p3, %p95_p0 }
  0x83   :  { %v18_v10 = vpop.permute.xlu0 %17 }
  0x84   :  { %vm19_vm1 = vcmp.eq.s32.totalorder %v15_v8, %v18_v10 }
  0x85   :  { %v26_v11 = vsel %vm19_vm1, %v12_v2, 0.0  ;;  %v25_v12 = vsel %vm19_vm1, -1e+30, %v24_v9 }
  0x86   :  { %v28_v13 = vsel %vm27_vm0, %v26_v11, 0.0  ;;  %v31_v14 = vsel %vm27_vm0, %v25_v12, -inf }
  0x87   :  { %29 = vadd.xlane.f32.xlu0 %v28_v13  ;;  %32 = vmax.xlane.f32.xlu1 %v31_v14 }
 0x114   :  { %v30_v15 = vpop.xlane.xlu0 %29  ;;  %v33_v21 = vpop.xlane.xlu1 %32 }
 0x115   :  { %v34_v16 = vsub.f32 1.5, %v30_v15  ;;  %v82_v18 = vadd.f32 -0.5, %v30_v15 }
 0x117   :  { %v35_v17 = vmax.f32 %v34_v16, 0.0 }
 0x119   :  { %v37_v19 = vmul.f32 %v82_v18, %v35_v17 }
 0x11b   :  { %v38_v20 = vmul.f32 2.0, %v37_v19 }
 0x11d   :  { %v39_v22 = vmax.f32 %v33_v21, %v38_v20 }
 0x11f   :  { %v40_v23 = vsub.f32 %v25_v12, %v39_v22  ;;  %v46_v27 = vsub.f32 %v38_v20, %v39_v22 }
 0x121   :  { %v41_v24 = vmul.f32 1.442695, %v40_v23  ;;  %v47_v28 = vmul.f32 1.442695, %v46_v27 }
 0x123   :  { %88 = vpow2.f32 %v41_v24 }
 0x124   :  { %90 = vpow2.f32 %v47_v28 }
 0x12d   :  { %v89_v25 = vpop.eup %88 }
 0x12e   :  { %v43_v26 = vsel %vm27_vm0, %v89_v25, 0.0  ;;  %v91_v29 = vpop.eup %90 }
 0x12f   :  { %44 = vadd.xlane.f32.xlu1 %v43_v26 }
 0x1bc   :  { %v45_v30 = vpop.xlane.xlu1 %44 }
 0x1bd   :  { %v49_v31 = vadd.f32 %v91_v29, %v45_v30 }
 0x1bf   :  { %92 = vlog2.f32 %v49_v31 }
 0x1c9   :  { %v93_v32 = vpop.eup %92 }
 0x1ca   :  { %v51_v33 = vmul.f32 0.6931472, %v93_v32 }
 0x1cc   :  { %v52_v34 = vadd.f32 %v51_v33, %v39_v22 }
 0x1ce   :  { %v53_v35 = vsub.f32 %v52_v34, %v38_v20 }
 0x1d0   :  { %v55_v36 = vsel %vm54_vm2, %v53_v35, 0.0 }
 0x1d1   :  { %56 = vadd.xlane.f32.xlu1 %v55_v36 }
 0x25e   :  { %v57_v37 = vpop.xlane.xlu1 %56 }
 0x25f   :  { %v58_v38 = vrot.slane %v57_v37, 4 }
 0x261   :  { %v59_v39 = vadd.f32 %v58_v38, %v57_v37 }
 0x263   :  { %v60_v40 = vrot.slane %v59_v39, 2 }
 0x265   :  { %v61_v41 = vadd.f32 %v60_v40, %v59_v39 }
 0x267   :  { %v62_v42 = vrot.slane %v61_v41, 1 }
 0x269   :  { %v63_v43 = vadd.f32 %v62_v42, %v61_v41 }
 0x26b   :  { %83 = vpush %v63_v43 }
 0x29c   :  { %s84_s13 = spop %83 }
 0x29d   :  { %v65_v44 = vstv %s84_s13 }
 0x29e   :  { %66 = vst [vmem:[#allocation2] sm:$0xff] %v65_v44 }
 0x29f   :  { %105 = shalt.err (!%p102_p4)
}
 0x2a0   :  { %s106_s17 = scalar_lea.hbm %s158_s2, 128 }
 0x2a1   :  { %p107_p5 = scmp.ne.s32.totalorder %s158_s2, %s106_s17  ;;  %p110_p6 = scmp.lt.u32.totalorder %s106_s17, %s158_s2 }
 0x2a3   :  { %p112_p7 = pnand %p110_p6, %p107_p5 }
 0x2a5   :  { %115 = shalt.err (!%p112_p7)
}
 0x2a6   :  { %76 = dma.vmem_to_hbm [thread:$0]  %s74_s1, 128, %s158_s2, [#allocation3]  }
 0x2a7   :  { %116 = dma.done.wait [#allocation3], 128  }
 0x2a8   :  { %117 = vsyncadd [#allocation3], 4294967168 }
 0x2a9   :  { %80 = vsyncpa [#allocation3], 1 }

</bundles_post_ra>
